<compile_context>
chip_gen: v7x
topology: tpu7x:2x2x1
jax: 0.10.0
libtpu: 0.0.40
codegen_flags: <defaults>
</compile_context>

<pallas_src>
import functools

import jax
import jax.numpy as jnp
from jax.experimental import pallas as pl
from jax.experimental.pallas import tpu as pltpu

INPUT_SIZE = 131
HIDDEN_SIZE = 128
FC2_SIZE = 128
OUTPUT_SIZE = 41

DEFAULT_BATCH_TILE = 1024  # sweepable: 512 / 1024 / 2048 (cap ~1024 on v5e)


def _round_up(n, m):
    return pl.cdiv(n, m) * m


def _diagnose_kernel(x_ref, w1_ref, b1_ref, w2_ref, b2_ref, w3_ref, b3_ref,
                     out_ref):
    # x_ref:  (BT, 131)   f32 (cast to compute dtype in-kernel)
    # w1_ref: (131, 128)  compute dtype (bf16 or f32)
    # b1_ref: (1, 128)    f32
    # w2_ref: (128, 128)  compute dtype
    # b2_ref: (1, 128)    f32
    # w3_ref: (128, 41)   compute dtype
    # b3_ref: (1, 41)     f32
    # out_ref:(BT, 41)    f32
    cdt = w1_ref.dtype
    x = x_ref[...].astype(cdt)  # fused cast (VPU has slack under the DMA bound)

    # fc1 + ReLU  (Dropout is identity in eval mode)
    h1 = jnp.dot(x, w1_ref[...], preferred_element_type=jnp.float32)
    h1 = jnp.maximum(h1 + b1_ref[...], 0.0)

    # fc2 + ReLU  (Dropout is identity in eval mode)
    h2 = jnp.dot(h1.astype(cdt), w2_ref[...],
                 preferred_element_type=jnp.float32)
    h2 = jnp.maximum(h2 + b2_ref[...], 0.0)

    # fc3
    logits = jnp.dot(h2.astype(cdt), w3_ref[...],
                     preferred_element_type=jnp.float32)
    logits = logits + b3_ref[...]

    # Softmax over the feature axis (exact normalization: rows sum to 1).
    m = jnp.max(logits, axis=-1, keepdims=True)
    e = jnp.exp(logits - m)
    denom = jnp.sum(e, axis=-1, keepdims=True)
    out_ref[...] = (e / denom).astype(out_ref.dtype)


@functools.partial(jax.jit, static_argnames=("compute_dtype", "batch_tile"))
def diagnose_forward(x, w1, b1, w2, b2, w3, b3,
                     *, compute_dtype=jnp.bfloat16,
                     batch_tile=DEFAULT_BATCH_TILE):
    """x: (B, INPUT_SIZE) float32 -> (B, OUTPUT_SIZE) float32 softmax probs."""
    B = x.shape[0]

    # Adaptive batch tile: multiple of 8 sublanes; big batches amortize the
    # ~0.35us grid-step overhead.  Keep >=2 grid steps when possible so the
    # "parallel" axis can shard across both v7x TensorCores.
    bt = min(batch_tile, _round_up(max(B, 1), 8))
    if B > 8 and pl.cdiv(B, bt) < 2:
        bt = max(8, _round_up(pl.cdiv(B, 2), 8))
    grid = (pl.cdiv(B, bt),)

    # Weights are tiny (~38K params): cast once here; biases stay f32.
    w1_c = w1.astype(compute_dtype)
    w2_c = w2.astype(compute_dtype)
    w3_c = w3.astype(compute_dtype)
    b1_c = b1.astype(jnp.float32).reshape(1, HIDDEN_SIZE)
    b2_c = b2.astype(jnp.float32).reshape(1, FC2_SIZE)
    b3_c = b3.astype(jnp.float32).reshape(1, OUTPUT_SIZE)

    return pl.pallas_call(
        _diagnose_kernel,
        out_shape=jax.ShapeDtypeStruct((B, OUTPUT_SIZE), jnp.float32),
        grid_spec=pltpu.PrefetchScalarGridSpec(
            num_scalar_prefetch=0,
            grid=grid,
            in_specs=[
                # x: unpadded, last dim 131 == full array dim (legal block).
                pl.BlockSpec((bt, INPUT_SIZE), lambda i: (i, 0)),
                # Constant block indices -> weights/biases stay VMEM-resident
                # across grid steps (no per-step re-DMA).
                pl.BlockSpec((INPUT_SIZE, HIDDEN_SIZE), lambda i: (0, 0)),
                pl.BlockSpec((1, HIDDEN_SIZE), lambda i: (0, 0)),
                pl.BlockSpec((HIDDEN_SIZE, FC2_SIZE), lambda i: (0, 0)),
                pl.BlockSpec((1, FC2_SIZE), lambda i: (0, 0)),
                pl.BlockSpec((FC2_SIZE, OUTPUT_SIZE), lambda i: (0, 0)),
                pl.BlockSpec((1, OUTPUT_SIZE), lambda i: (0, 0)),
            ],
            # Unpadded 41-wide output: 164 B/row writeback, no wrapper slice.
            out_specs=pl.BlockSpec((bt, OUTPUT_SIZE), lambda i: (i, 0)),
        ),
        compiler_params=pltpu.CompilerParams(
            dimension_semantics=("parallel",)),
    )(x, w1_c, b1_c, w2_c, b2_c, w3_c, b3_c)


def init_params(key):
    """Deterministic synthetic params; layout (fan_in, fan_out)."""
    ks = jax.random.split(key, 6)

    def uniform_init(k, shape, fan_in):
        bound = 1.0 / jnp.sqrt(jnp.float32(fan_in))
        return jax.random.uniform(k, shape, jnp.float32, -bound, bound)

    w1 = uniform_init(ks[0], (INPUT_SIZE, HIDDEN_SIZE), INPUT_SIZE)
    b1 = uniform_init(ks[1], (1, HIDDEN_SIZE), INPUT_SIZE)
    w2 = uniform_init(ks[2], (HIDDEN_SIZE, FC2_SIZE), HIDDEN_SIZE)
    b2 = uniform_init(ks[3], (1, FC2_SIZE), HIDDEN_SIZE)
    w3 = uniform_init(ks[4], (FC2_SIZE, OUTPUT_SIZE), FC2_SIZE)
    b3 = uniform_init(ks[5], (1, OUTPUT_SIZE), FC2_SIZE)
    return w1, b1, w2, b2, w3, b3


def reference_forward(x, w1, b1, w2, b2, w3, b3, compute_dtype=jnp.float32):
    """Pure-JAX reference mirroring the kernel's compute-dtype rounding."""
    f32 = jnp.float32
    cd = compute_dtype
    xc = x.astype(cd).astype(f32)
    w1c = w1.astype(cd).astype(f32)
    w2c = w2.astype(cd).astype(f32)
    w3c = w3.astype(cd).astype(f32)
    h1 = jnp.maximum(xc @ w1c + b1, 0.0).astype(cd).astype(f32)
    h2 = jnp.maximum(h1 @ w2c + b2, 0.0).astype(cd).astype(f32)
    logits = h2 @ w3c + b3
    return jax.nn.softmax(logits, axis=1)


if __name__ == "__main__":
    key = jax.random.PRNGKey(0)
    k_x, k_p = jax.random.split(key)
    params = init_params(k_p)

    # --- small batch (single ragged grid step) -----------------------------
    batch = 2
    x = jax.random.normal(k_x, (batch, INPUT_SIZE), jnp.float32)

    out_bf16 = jax.block_until_ready(diagnose_forward(x, *params))
    ref_bf16 = reference_forward(x, *params, compute_dtype=jnp.bfloat16)
    assert out_bf16.shape == (batch, OUTPUT_SIZE), out_bf16.shape
    assert jnp.allclose(out_bf16, ref_bf16, atol=2e-3), float(
        jnp.max(jnp.abs(out_bf16 - ref_bf16)))
    assert jnp.allclose(jnp.sum(out_bf16, axis=1), 1.0, atol=1e-3)

    out_f32 = jax.block_until_ready(
        diagnose_forward(x, *params, compute_dtype=jnp.float32))
    ref_f32 = reference_forward(x, *params, compute_dtype=jnp.float32)
    assert jnp.allclose(out_f32, ref_f32, atol=1e-3), float(
        jnp.max(jnp.abs(out_f32 - ref_f32)))
    assert jnp.allclose(jnp.sum(out_f32, axis=1), 1.0, atol=1e-3)

    # --- larger batch (multiple grid steps + masked ragged tail) -----------
    batch2 = 300
    x2 = jax.random.normal(jax.random.PRNGKey(1), (batch2, INPUT_SIZE),
                           jnp.float32)
    out2 = jax.block_until_ready(diagnose_forward(x2, *params))
    ref2 = reference_forward(x2, *params, compute_dtype=jnp.bfloat16)
    assert out2.shape == (batch2, OUTPUT_SIZE), out2.shape
    assert jnp.allclose(out2, ref2, atol=2e-3), float(
        jnp.max(jnp.abs(out2 - ref2)))
    assert jnp.allclose(jnp.sum(out2, axis=1), 1.0, atol=1e-3)

    print("KERNEL_OK")
</pallas_src>

<mosaic_0001>
module attributes {stable_mosaic.version = 11 : i64} {
  func.func @_diagnose_kernel(%arg0: i32, %arg1: memref<8x131xf32, #tpu.memory_space<vmem>>, %arg2: memref<131x128xbf16, #tpu.memory_space<vmem>>, %arg3: memref<1x128xf32, #tpu.memory_space<vmem>>, %arg4: memref<128x128xbf16, #tpu.memory_space<vmem>>, %arg5: memref<1x128xf32, #tpu.memory_space<vmem>>, %arg6: memref<128x41xbf16, #tpu.memory_space<vmem>>, %arg7: memref<1x41xf32, #tpu.memory_space<vmem>>, %arg8: memref<8x41xf32, #tpu.memory_space<vmem>>) attributes {dimension_semantics = [#tpu.dimension_semantics<parallel>], iteration_bounds = array<i64: 1>, scalar_prefetch = 0 : i64, scratch_operands = 0 : i64, tpu.core_type = #tpu.core_type<tc>, window_params = [{transform_indices = @transform_0, window_bounds = array<i64: 8, 131>}, {pipeline_mode = #tpu.pipeline_mode<synchronous>, transform_indices = @transform_1, window_bounds = array<i64: 131, 128>}, {pipeline_mode = #tpu.pipeline_mode<synchronous>, transform_indices = @transform_2, window_bounds = array<i64: 1, 128>}, {pipeline_mode = #tpu.pipeline_mode<synchronous>, transform_indices = @transform_3, window_bounds = array<i64: 128, 128>}, {pipeline_mode = #tpu.pipeline_mode<synchronous>, transform_indices = @transform_4, window_bounds = array<i64: 1, 128>}, {pipeline_mode = #tpu.pipeline_mode<synchronous>, transform_indices = @transform_5, window_bounds = array<i64: 128, 41>}, {pipeline_mode = #tpu.pipeline_mode<synchronous>, transform_indices = @transform_6, window_bounds = array<i64: 1, 41>}, {transform_indices = @transform_7, window_bounds = array<i64: 8, 41>}]} {
    %c0 = arith.constant 0 : index
    %c0_0 = arith.constant 0 : index
    %0 = vector.load %arg1[%c0, %c0_0] : memref<8x131xf32, #tpu.memory_space<vmem>>, vector<8x131xf32>
    %1 = arith.truncf %0 : vector<8x131xf32> to vector<8x131xbf16>
    %c0_1 = arith.constant 0 : index
    %c0_2 = arith.constant 0 : index
    %2 = vector.load %arg2[%c0_1, %c0_2] : memref<131x128xbf16, #tpu.memory_space<vmem>>, vector<131x128xbf16>
    %cst = arith.constant dense<0.000000e+00> : vector<8x128xf32>
    %3 = tpu.matmul %1, %2, %cst {dimension_numbers = #tpu.dot_dimension_numbers<[1], [0], [0], [1], [0, 0, 1, 1], [], []>} : vector<8x131xbf16>, vector<131x128xbf16>, vector<8x128xf32> -> vector<8x128xf32>
    %c0_3 = arith.constant 0 : index
    %c0_4 = arith.constant 0 : index
    %4 = vector.load %arg3[%c0_3, %c0_4] : memref<1x128xf32, #tpu.memory_space<vmem>>, vector<1x128xf32>
    %5 = vector.broadcast %4 : vector<1x128xf32> to vector<8x128xf32>
    %6 = arith.addf %3, %5 : vector<8x128xf32>
    %cst_5 = arith.constant 0.000000e+00 : f32
    %7 = vector.broadcast %cst_5 : f32 to vector<8x128xf32>
    %8 = arith.maximumf %6, %7 : vector<8x128xf32>
    %9 = arith.truncf %8 : vector<8x128xf32> to vector<8x128xbf16>
    %c0_6 = arith.constant 0 : index
    %c0_7 = arith.constant 0 : index
    %10 = vector.load %arg4[%c0_6, %c0_7] : memref<128x128xbf16, #tpu.memory_space<vmem>>, vector<128x128xbf16>
    %cst_8 = arith.constant dense<0.000000e+00> : vector<8x128xf32>
    %11 = tpu.matmul %9, %10, %cst_8 {dimension_numbers = #tpu.dot_dimension_numbers<[1], [0], [0], [1], [0, 0, 1, 1], [], []>} : vector<8x128xbf16>, vector<128x128xbf16>, vector<8x128xf32> -> vector<8x128xf32>
    %c0_9 = arith.constant 0 : index
    %c0_10 = arith.constant 0 : index
    %12 = vector.load %arg5[%c0_9, %c0_10] : memref<1x128xf32, #tpu.memory_space<vmem>>, vector<1x128xf32>
    %13 = vector.broadcast %12 : vector<1x128xf32> to vector<8x128xf32>
    %14 = arith.addf %11, %13 : vector<8x128xf32>
    %cst_11 = arith.constant 0.000000e+00 : f32
    %15 = vector.broadcast %cst_11 : f32 to vector<8x128xf32>
    %16 = arith.maximumf %14, %15 : vector<8x128xf32>
    %17 = arith.truncf %16 : vector<8x128xf32> to vector<8x128xbf16>
    %c0_12 = arith.constant 0 : index
    %c0_13 = arith.constant 0 : index
    %18 = vector.load %arg6[%c0_12, %c0_13] : memref<128x41xbf16, #tpu.memory_space<vmem>>, vector<128x41xbf16>
    %cst_14 = arith.constant dense<0.000000e+00> : vector<8x41xf32>
    %19 = tpu.matmul %17, %18, %cst_14 {dimension_numbers = #tpu.dot_dimension_numbers<[1], [0], [0], [1], [0, 0, 1, 1], [], []>} : vector<8x128xbf16>, vector<128x41xbf16>, vector<8x41xf32> -> vector<8x41xf32>
    %c0_15 = arith.constant 0 : index
    %c0_16 = arith.constant 0 : index
    %20 = vector.load %arg7[%c0_15, %c0_16] : memref<1x41xf32, #tpu.memory_space<vmem>>, vector<1x41xf32>
    %21 = vector.broadcast %20 : vector<1x41xf32> to vector<8x41xf32>
    %22 = arith.addf %19, %21 : vector<8x41xf32>
    %cst_17 = arith.constant dense<0xFF800000> : vector<8xf32>
    %23 = vector.multi_reduction <maximumf>, %22, %cst_17 [1] : vector<8x41xf32> to vector<8xf32>
    %24 = vector.shape_cast %23 : vector<8xf32> to vector<8x1xf32>
    %25 = vector.broadcast %24 : vector<8x1xf32> to vector<8x41xf32>
    %26 = arith.subf %22, %25 : vector<8x41xf32>
    %27 = math.exp %26 : vector<8x41xf32>
    %cst_18 = arith.constant dense<0.000000e+00> : vector<8xf32>
    %28 = vector.multi_reduction <add>, %27, %cst_18 [1] : vector<8x41xf32> to vector<8xf32>
    %29 = vector.shape_cast %28 : vector<8xf32> to vector<8x1xf32>
    %30 = vector.broadcast %29 : vector<8x1xf32> to vector<8x41xf32>
    %31 = arith.divf %27, %30 : vector<8x41xf32>
    %c0_19 = arith.constant 0 : index
    %c0_20 = arith.constant 0 : index
    %32 = vector.load %arg8[%c0_19, %c0_20] : memref<8x41xf32, #tpu.memory_space<vmem>>, vector<8x41xf32>
    tpu.vector_store %arg8[%c0_19, %c0_20], %31 {strides = array<i32>} : memref<8x41xf32, #tpu.memory_space<vmem>>, vector<8x41xf32>,
    return
  }
  func.func @transform_0(%arg0: i32) -> (i32, i32) {
    %c0_i32 = arith.constant 0 : i32
    %c0_i32_0 = arith.constant 0 : i32
    return %arg0, %c0_i32 : i32, i32
  }
  func.func @transform_1(%arg0: i32) -> (i32, i32) {
    %c0_i32 = arith.constant 0 : i32
    %c0_i32_0 = arith.constant 0 : i32
    %c0_i32_1 = arith.constant 0 : i32
    return %c0_i32, %c0_i32_0 : i32, i32
  }
  func.func @transform_2(%arg0: i32) -> (i32, i32) {
    %c0_i32 = arith.constant 0 : i32
    %c0_i32_0 = arith.constant 0 : i32
    %c0_i32_1 = arith.constant 0 : i32
    return %c0_i32, %c0_i32_0 : i32, i32
  }
  func.func @transform_3(%arg0: i32) -> (i32, i32) {
    %c0_i32 = arith.constant 0 : i32
    %c0_i32_0 = arith.constant 0 : i32
    %c0_i32_1 = arith.constant 0 : i32
    return %c0_i32, %c0_i32_0 : i32, i32
  }
  func.func @transform_4(%arg0: i32) -> (i32, i32) {
    %c0_i32 = arith.constant 0 : i32
    %c0_i32_0 = arith.constant 0 : i32
    %c0_i32_1 = arith.constant 0 : i32
    return %c0_i32, %c0_i32_0 : i32, i32
  }
  func.func @transform_5(%arg0: i32) -> (i32, i32) {
    %c0_i32 = arith.constant 0 : i32
    %c0_i32_0 = arith.constant 0 : i32
    %c0_i32_1 = arith.constant 0 : i32
    return %c0_i32, %c0_i32_0 : i32, i32
  }
  func.func @transform_6(%arg0: i32) -> (i32, i32) {
    %c0_i32 = arith.constant 0 : i32
    %c0_i32_0 = arith.constant 0 : i32
    %c0_i32_1 = arith.constant 0 : i32
    return %c0_i32, %c0_i32_0 : i32, i32
  }
  func.func @transform_7(%arg0: i32) -> (i32, i32) {
    %c0_i32 = arith.constant 0 : i32
    %c0_i32_0 = arith.constant 0 : i32
    return %arg0, %c0_i32 : i32, i32
  }
}

</mosaic_0001>

<bundles_post_ra>
// kernel: diagnose_forward.1
= control target key start
LH: loop header
LB: loop body
LE: loop exit
PB: predicated region body
PF: predicated region fallthrough
CT: control target
= control target key end

     0   :  { %12 = vsyncpa [#allocation3], 0  ;;  %v591_v1 = vmov 0   ;;  %v592_v7 = vmov 0.0   ;;  %vm137_vm0 = vcmask 1040384   ;;  %vm133_vm1 = vcmask 23552   ;;  %s762_s0 = inlined_call_operand.vmem [shape: f32[2,131], index: 0, kind: input, shape index: {}]   ;;  %s763_s1 = inlined_call_operand.vmem [shape: bf16[131,128], index: 1, kind: input, shape index: {}]   ;;  %s764_s2 = inlined_call_operand.vmem [shape: f32[1,128], index: 2, kind: input, shape index: {}]   ;;  %s765_s3 = inlined_call_operand.vmem [shape: bf16[128,128], index: 3, kind: input, shape index: {}]   ;;  %s766_s4 = inlined_call_operand.vmem [shape: f32[1,128], index: 4, kind: input, shape index: {}]   ;;  %s767_s5 = inlined_call_operand.vmem [shape: bf16[128,41], index: 5, kind: input, shape index: {}]   ;;  %s768_s6 = inlined_call_operand.vmem [shape: f32[1,41], index: 6, kind: input, shape index: {}]   ;;  %s769_s7 = inlined_call_operand.hbm [shape: f32[2,41], index: 7, kind: output, shape index: {}]  }
   0x1   :  { %v534_v0 = vld [vmem:[%s763_s1] sm:$0xff]   ;;  %144 = vmatprep.subr.bf16.mxu0 %v591_v1  ;;  %v535_v2 = vld [vmem:[%s763_s1 + $0x8] sm:$0xff]   ;;  %v536_v3 = vld [vmem:[%s763_s1 + $0x10] sm:$0xff]   ;;  %486 = vmatprep.subr.bf16.mxu1 %v592_v7  ;;  %vm138_vm2 = vcmask 1041408   ;;  %v593_v17 = vmov 65535   ;;  %vm594_vm3 = vmmov 0  }
   0x2   :  { %145 = vmatpush1.bf16.msra.mxu0 %v534_v0  ;;  %v537_v4 = vld [vmem:[%s763_s1 + $0x18] sm:$0xff]   ;;  %v565_v5 = vld.sshfl [vmem:[%s762_s0] sm:$0xff pattern:$0x76325410]  ;;  %v546_v10 = vld [vmem:[%s765_s3 + $0x8] sm:$0xff]   ;;  %v139_v18 = vsel %vm137_vm0, 4294967295, %v593_v17  ;;  %502 = vmatprep.mubr.msk.bf16.mxu1 %vm594_vm3, %v592_v7 }
   0x3   :  { %146 = vmatprep.subr.bf16.mxu0 %v591_v1  ;;  %v538_v6 = vld [vmem:[%s763_s1 + $0x20] sm:$0xff]   ;;  %v566_v9 = vld.sshfl [vmem:[%s762_s0 + $0x8] sm:$0xff pattern:$0x76325410]  ;;  %v547_v12 = vld [vmem:[%s765_s3 + $0x10] sm:$0xff]   ;;  %v140_v22 = vsel %vm138_vm2, %v139_v18, 0 }
   0x4   :  { %v545_v8 = vld [vmem:[%s765_s3] sm:$0xff]   ;;  %v539_v11 = vld [vmem:[%s763_s1 + $0x28] sm:$0xff]   ;;  %v53_v13 = vcombine.high %v565_v5, %v566_v9  ;;  %v540_v14 = vld [vmem:[%s763_s1 + $0x30] sm:$0xff]   ;;  %v52_v23 = vcombine.low %v565_v5, %v566_v9  ;;  %vm410_vm4 = vcmask 334848  }
   0x5   :  { %487 = vmatpush3.bf16.msra.mxu1 %v545_v8  ;;  %v548_v15 = vld [vmem:[%s765_s3 + $0x18] sm:$0xff]   ;;  %v542_v20 = vld [vmem:[%s763_s1 + $0x40] ss:$0 sps:$4 sm:$0x33]   ;;  %v550_v25 = vld [vmem:[%s765_s3 + $0x28] sm:$0xff]  }
   0x6   :  { %147 = vmatpush1.bf16.msra.mxu0 %v535_v2  ;;  %488 = vmatprep.subr.bf16.mxu1 %v592_v7  ;;  %v57_v16 = vpack.c.bf16 %v53_v13, %v53_v13  ;;  %v541_v19 = vld [vmem:[%s763_s1 + $0x38] sm:$0xff]   ;;  %v549_v21 = vld [vmem:[%s765_s3 + $0x20] sm:$0xff]   ;;  %v142_v24 = vand.u32 %v542_v20, %v140_v22  ;;  %v56_v26 = vpack.c.bf16 %v52_v23, %v52_v23  ;;  %v551_v27 = vld [vmem:[%s765_s3 + $0x30] sm:$0xff]  }
   0x7   :  { %148 = vmatprep.subr.bf16.mxu0 %v591_v1  ;;  %v552_v28 = vld [vmem:[%s765_s3 + $0x38] sm:$0xff]   ;;  %v439_v29 = vld [vmem:[%s764_s2] ss:$0 sm:$0xff]  ;;  %v554_v38 = vld [vmem:[%s767_s5 + $0x8] sm:$0xff]  }
   0x8   :  { %449 = vmatprep.mubr.msk.bf16.mxu0 %vm133_vm1, %v57_v16  ;;  %v553_v36 = vld [vmem:[%s767_s5] sm:$0xff]   ;;  %v555_v39 = vld [vmem:[%s767_s5 + $0x10] sm:$0xff]   ;;  %v556_v40 = vld [vmem:[%s767_s5 + $0x18] sm:$0xff]  }
   0x9   :  { %489 = vmatpush3.bf16.msra.mxu1 %v546_v10  ;;  %v557_v41 = vld [vmem:[%s767_s5 + $0x20] sm:$0xff]   ;;  %v558_v42 = vld [vmem:[%s767_s5 + $0x28] sm:$0xff]   ;;  %v559_v43 = vld [vmem:[%s767_s5 + $0x30] sm:$0xff]  }
   0xa   :  { %149 = vmatpush1.bf16.msra.mxu0 %v536_v3  ;;  %490 = vmatprep.subr.bf16.mxu1 %v592_v7  ;;  %v560_v44 = vld [vmem:[%s767_s5 + $0x38] sm:$0xff]   ;;  %v450_v45 = vld [vmem:[%s766_s4] ss:$0 sm:$0xff] }
   0xb   :  { %150 = vmatprep.subr.bf16.mxu0 %v591_v1  ;;  %v459_v53 = vld [vmem:[%s768_s6] ss:$0 sm:$0xff] }
   0xd   :  { %491 = vmatpush3.bf16.msra.mxu1 %v547_v12 }
   0xe   :  { %151 = vmatpush1.bf16.msra.mxu0 %v537_v4  ;;  %492 = vmatprep.subr.bf16.mxu1 %v592_v7 }
   0xf   :  { %152 = vmatprep.subr.bf16.mxu0 %v591_v1 }
  0x11   :  { %493 = vmatpush3.bf16.msra.mxu1 %v548_v15 }
  0x12   :  { %153 = vmatpush1.bf16.msra.mxu0 %v538_v6  ;;  %494 = vmatprep.subr.bf16.mxu1 %v592_v7 }
  0x13   :  { %154 = vmatprep.subr.bf16.mxu0 %v591_v1 }
  0x15   :  { %495 = vmatpush3.bf16.msra.mxu1 %v549_v21 }
  0x16   :  { %155 = vmatpush1.bf16.msra.mxu0 %v539_v11  ;;  %496 = vmatprep.subr.bf16.mxu1 %v592_v7 }
  0x17   :  { %156 = vmatprep.subr.bf16.mxu0 %v591_v1 }
  0x19   :  { %497 = vmatpush3.bf16.msra.mxu1 %v550_v25 }
  0x1a   :  { %157 = vmatpush1.bf16.msra.mxu0 %v540_v14  ;;  %498 = vmatprep.subr.bf16.mxu1 %v592_v7 }
  0x1b   :  { %158 = vmatprep.subr.bf16.mxu0 %v591_v1 }
  0x1d   :  { %499 = vmatpush3.bf16.msra.mxu1 %v551_v27 }
  0x1e   :  { %159 = vmatpush1.bf16.msra.mxu0 %v541_v19  ;;  %500 = vmatprep.subr.bf16.mxu1 %v592_v7 }
  0x1f   :  { %160 = vmatprep.subr.bf16.mxu0 %v591_v1 }
  0x21   :  { %501 = vmatpush3.bf16.msra.mxu1 %v552_v28 }
  0x22   :  { %161 = vmatpush1.bf16.msra.mxu0 %v142_v24  ;;  %506 = vmatprep.subr.bf16.mxu1 %v592_v7 }
  0x25   :  { %177 = vmatmul.mubr.bf16.vlgmr.msra.gmra.mrb[0].mxu0 %v56_v26 }
  0xf8   :  { %v178_v30 = vpop.f32.mrb[0].mxu0 }
  0xf9   :  { %v179_v31 = vadd.f32 %v439_v29, %v178_v30  ;;  %v180_v32 = vpop.f32.mrb[1].mxu0 }
  0xfa   :  { %v181_v33 = vpop.f32.mrb[2].mxu0 }
  0xfb   :  { %v184_v34 = vmax.f32 %v179_v31, 0.0  ;;  %v182_v35 = vpop.f32.mrb[3].mxu0 }
  0xfd   :  { %v185_v37 = vpack.c.bf16 %v184_v34, %v184_v34 }
  0xff   :  { %503 = vmatmul.mubr.bf16.vlgmr.msra.gmra.mrb[0].mxu1 %v185_v37 }
 0x100   :  { %507 = vmatpush3.bf16.msra.mxu1 %v553_v36  ;;  %522 = vmatprep.mubr.msk.bf16.mxu1 %vm594_vm3, %v592_v7 }
 0x101   :  { %508 = vmatprep.subr.bf16.mxu1 %v592_v7 }
 0x104   :  { %509 = vmatpush3.bf16.msra.mxu1 %v554_v38 }
 0x105   :  { %510 = vmatprep.subr.bf16.mxu1 %v592_v7 }
 0x108   :  { %511 = vmatpush3.bf16.msra.mxu1 %v555_v39 }
 0x109   :  { %512 = vmatprep.subr.bf16.mxu1 %v592_v7 }
 0x10c   :  { %513 = vmatpush3.bf16.msra.mxu1 %v556_v40 }
 0x10d   :  { %514 = vmatprep.subr.bf16.mxu1 %v592_v7 }
 0x110   :  { %515 = vmatpush3.bf16.msra.mxu1 %v557_v41 }
 0x111   :  { %516 = vmatprep.subr.bf16.mxu1 %v592_v7 }
 0x114   :  { %517 = vmatpush3.bf16.msra.mxu1 %v558_v42 }
 0x115   :  { %518 = vmatprep.subr.bf16.mxu1 %v592_v7 }
 0x118   :  { %519 = vmatpush3.bf16.msra.mxu1 %v559_v43 }
 0x119   :  { %520 = vmatprep.subr.bf16.mxu1 %v592_v7 }
 0x11c   :  { %521 = vmatpush3.bf16.msra.mxu1 %v560_v44 }
 0x1d2   :  { %v291_v46 = vpop.f32.mrb[0].mxu1 }
 0x1d3   :  { %v292_v47 = vadd.f32 %v450_v45, %v291_v46  ;;  %v504_v48 = vpop.f32.mrb[1].mxu1 }
 0x1d4   :  { %v294_v49 = vpop.f32.mrb[2].mxu1 }
 0x1d5   :  { %v297_v50 = vmax.f32 %v292_v47, 0.0  ;;  %v505_v51 = vpop.f32.mrb[3].mxu1 }
 0x1d7   :  { %v298_v52 = vpack.c.bf16 %v297_v50, %v297_v50 }
 0x1d9   :  { %523 = vmatmul.mubr.bf16.vlgmr.msra.gmra.mrb[4].mxu1 %v298_v52 }
 0x2ac   :  { %v404_v54 = vpop.f32.mrb[4].mxu1 }
 0x2ad   :  { %v405_v55 = vadd.f32 %v459_v53, %v404_v54  ;;  %v524_v56 = vpop.f32.mrb[5].mxu1 }
 0x2ae   :  { %v407_v57 = vpop.f32.mrb[6].mxu1 }
 0x2af   :  { %v525_v58 = vpop.f32.mrb[7].mxu1  ;;  %v411_v59 = vsel %vm410_vm4, %v405_v55, -inf }
 0x2b0   :  { %412 = vmax.xlane.f32.xlu0 %v411_v59 }
 0x33d   :  { %v413_v60 = vpop.xlane.xlu0 %412 }
 0x33e   :  { %v414_v61 = vsub.f32 %v405_v55, %v413_v60 }
 0x340   :  { %v415_v62 = vmul.f32 1.442695, %v414_v61 }
 0x342   :  { %561 = vpow2.f32 %v415_v62 }
 0x34c   :  { %v562_v63 = vpop.eup %561 }
 0x34d   :  { %v417_v0 = vsel %vm410_vm4, %v562_v63, 0.0 }
 0x34e   :  { %418 = vadd.xlane.f32.xlu0 %v417_v0 }
 0x3db   :  { %v419_v1 = vpop.xlane.xlu0 %418 }
 0x3dc   :  { %563 = vrcp.f32 %v419_v1 }
 0x3e6   :  { %v564_v2 = vpop.eup %563 }
 0x3e7   :  { %v421_v3 = vmul.f32 %v564_v2, %v562_v63 }
 0x3e9   :  { %422 = vst.msk [vmem:[#allocation2] sm:$0xff] %vm410_vm4, %v421_v3 }
 0x3ea   :  { %427 = vsyncadd [#allocation3], 96  ;;  %s595_s4 = smov [#allocation2]  }
 0x3eb   :  { %s428_s5 = sshll.u32 %s595_s4, 4  ;;  %s429_s5 = int_to_ptr.vmem [resolvable:$true] %s428_s5 }
 0x3ec   :  { %s567_s6 = scalar_lea.vmem %s429_s5, 32  ;;  %s571_s10 = scalar_lea.vmem %s429_s5, 128 }
 0x3ed   :  { %p568_p0 = scmp.ne.s32.totalorder %s429_s5, %s567_s6  ;;  %p572_p1 = scmp.lt.s32.totalorder %s429_s5, %s429_s5 }
 0x3ee   :  { %p573_p2 = scmp.lt.s32.totalorder %s571_s10, %s567_s6 }
 0x3f0   :  { %p574_p3 = por %p573_p2, %p572_p1 }
 0x3f2   :  { %p575_p4 = pnand %p574_p3, %p568_p0 }
 0x3f4   :  { %578 = shalt.err (!%p575_p4)
}
 0x3f5   :  { %s579_s12 = scalar_lea.hbm %s769_s7, 32 }
 0x3f6   :  { %p580_p5 = scmp.ne.s32.totalorder %s769_s7, %s579_s12  ;;  %p583_p6 = scmp.lt.u32.totalorder %s579_s12, %s769_s7 }
 0x3f8   :  { %p585_p7 = pnand %p583_p6, %p580_p5 }
 0x3fa   :  { %588 = shalt.err (!%p585_p7)
}
 0x3fb   :  { %s596_s17 = smov 32   ;;  %s597_s3 = smov 2  }
 0x3fc   :  { %434 = dma.vmem_to_hbm [thread:$0]  %s429_s5, 32, %s769_s7, [#allocation3], %s596_s17, %s596_s17, %s597_s3  }
 0x3fd   :  { %589 = dma.done.wait [#allocation3], 128  }
 0x3fe   :  { %590 = vsyncadd [#allocation3], 4294967168 }
 0x3ff   :  { %438 = vsyncpa [#allocation3], 1 }

</bundles_post_ra>
